<compile_context>
chip_gen: v5e
topology: v5e:2x2
jax: 0.10.0
libtpu: 0.0.40
codegen_flags: <defaults>
</compile_context>

<pallas_src>
import functools

import jax
import jax.numpy as jnp
from jax import lax
from jax.experimental import pallas as pl
from jax.experimental.pallas import tpu as pltpu


def _conv3x3_relu_kernel(x_ref, w_ref, b_ref, o_ref, *, img_h):
    """3x3 conv (stride=1, pad=1) + bias + ReLU as ONE banded matmul.

    x_ref : (B*H, W*Cin)        f32, rows of all images, (W, Cin) fused on lanes
    w_ref : (3*W*Cin, W*Cout)   banded weights; kh taps stacked along K
    b_ref : (1, W*Cout)         f32 bias tiled over the W positions on lanes
    o_ref : (B*H, W*Cout)       lane-dense output slab
    """
    x = x_ref[...]                       # (M, W*Cin), 32-bit rows
    m = x.shape[0]

    # Row index within each image (handles per-image H-padding AND keeps the
    # batch-fold correct: wrap rows across image boundaries are masked to 0).
    row = lax.broadcasted_iota(jnp.int32, x.shape, 0) % img_h
    zeros = jnp.zeros_like(x)

    # +/-1 row shifts via XLU rotates on unpacked 32-bit data (no scratch, no
    # zero-fill, no misaligned sublane copies).
    x_up = jnp.where(row == 0, zeros, pltpu.roll(x, shift=1, axis=0))        # row r-1
    x_dn = jnp.where(row == img_h - 1, zeros, pltpu.roll(x, shift=m - 1, axis=0))  # row r+1

    # Fold the 3 kh taps into K: single (M=B*H, K=3*W*Cin, N=W*Cout) MXU matmul.
    lhs = jnp.concatenate([x_up, x, x_dn], axis=1).astype(w_ref.dtype)
    acc = b_ref[...] + jnp.dot(lhs, w_ref[...], preferred_element_type=jnp.float32)

    # Fused ReLU, unmasked full-lane store.
    o_ref[...] = jnp.maximum(acc, 0.0).astype(o_ref.dtype)


def prepare_up_conv1_params(w_oihw, bias, *, width, compute_dtype=jnp.bfloat16):
    """Static (per-model) prep: banded weight + tiled bias.  Call once."""
    cout, cin = w_oihw.shape[0], w_oihw.shape[1]
    W = width
    # (Cout, Cin, 3, 3) -> (kh, kw, Cin, Cout)
    w_hwio = jnp.transpose(w_oihw, (2, 3, 1, 0)).astype(jnp.float32)
    # Band: Mc[kh, u*Cin+i, w*Cout+c] = w_hwio[kh, u-w+1, i, c] for u-w+1 in {0,1,2}
    # (folds the kw taps and the W-direction padding into the contraction).
    shift = jnp.stack([jnp.eye(W, dtype=jnp.float32, k=1 - kw) for kw in range(3)])
    w_band = jnp.einsum('xuw,hxio->huiwo', shift, w_hwio)       # (3, W, Cin, W, Cout)
    w_big = w_band.reshape(3 * W * cin, W * cout).astype(compute_dtype)
    b_row = jnp.tile(bias.astype(jnp.float32), W).reshape(1, W * cout)
    return w_big, b_row


def up_conv1_forward(x_nchw, w_big, b_row):
    """Conv2d(3x3, stride=1, pad=1, bias) + ReLU with PyTorch NCHW semantics."""
    B, Cin, H, W = x_nchw.shape
    Cout = b_row.shape[1] // W
    out_dtype = x_nchw.dtype

    # Single layout pass: NCHW -> (B*H, W*Cin), rows of all images stacked.
    x_rows = jnp.transpose(x_nchw, (0, 2, 3, 1)).reshape(B * H, W * Cin)
    x_rows = x_rows.astype(jnp.float32)   # rolls/masks run on unpacked 32-bit rows

    kernel = functools.partial(_conv3x3_relu_kernel, img_h=H)

    out2d = pl.pallas_call(
        kernel,
        out_shape=jax.ShapeDtypeStruct((B * H, W * Cout), out_dtype),
        grid_spec=pltpu.PrefetchScalarGridSpec(
            num_scalar_prefetch=0,
            grid=(1,),                               # collapsed: one kernel step
            in_specs=[
                pl.BlockSpec((B * H, W * Cin), lambda i: (0, 0)),
                pl.BlockSpec((3 * W * Cin, W * Cout), lambda i: (0, 0)),
                pl.BlockSpec((1, W * Cout), lambda i: (0, 0)),
            ],
            out_specs=pl.BlockSpec((B * H, W * Cout), lambda i: (0, 0)),
        ),
        compiler_params=pltpu.CompilerParams(
            dimension_semantics=("arbitrary",),
            vmem_limit_bytes=16 * 1024 * 1024,
        ),
    )(x_rows, w_big, b_row)

    # (B*H, W*Cout) -> (B, H, W, Cout) is a contiguous reshape; then back to NCHW.
    return jnp.transpose(out2d.reshape(B, H, W, Cout), (0, 3, 1, 2))


if __name__ == "__main__":
    key = jax.random.PRNGKey(0)
    kx, kw, kb = jax.random.split(key, 3)

    # Small shapes consistent with the module: ch_in=4, ch_out=8, 16x16 spatial.
    B, Cin, H, W = 2, 4, 16, 16
    Cout = 8

    x = jax.random.normal(kx, (B, Cin, H, W), dtype=jnp.float32)

    # Deterministic init mimicking PyTorch Conv2d defaults (uniform +/- 1/sqrt(fan_in)).
    fan_in = Cin * 3 * 3
    bound = 1.0 / (fan_in ** 0.5)
    w = jax.random.uniform(kw, (Cout, Cin, 3, 3), dtype=jnp.float32,
                           minval=-bound, maxval=bound)
    b = jax.random.uniform(kb, (Cout,), dtype=jnp.float32,
                           minval=-bound, maxval=bound)

    # Reference: XLA conv with PyTorch NCHW/OIHW semantics + bias + ReLU.
    ref = lax.conv_general_dilated(
        x, w, window_strides=(1, 1), padding=((1, 1), (1, 1)),
        dimension_numbers=("NCHW", "OIHW", "NCHW"))
    ref = jnp.maximum(ref + b[None, :, None, None], 0.0)

    # Exact-path check (f32 MXU operands) of the single banded-matmul kernel.
    w_big_f32, b_row = prepare_up_conv1_params(w, b, width=W,
                                               compute_dtype=jnp.float32)
    out_f32 = jax.block_until_ready(up_conv1_forward(x, w_big_f32, b_row))
    assert out_f32.shape == (B, Cout, H, W)
    assert out_f32.dtype == jnp.float32
    assert jnp.allclose(out_f32, ref, atol=1e-5, rtol=1e-5), \
        float(jnp.max(jnp.abs(out_f32 - ref)))

    # Default path (bf16 MXU operands, f32 accumulation): looser tolerance.
    w_big_bf16, b_row = prepare_up_conv1_params(w, b, width=W,
                                                compute_dtype=jnp.bfloat16)
    out = jax.block_until_ready(up_conv1_forward(x, w_big_bf16, b_row))
    assert out.shape == (B, Cout, H, W)
    assert out.dtype == jnp.float32
    assert jnp.allclose(out, ref, atol=3e-2, rtol=3e-2), \
        float(jnp.max(jnp.abs(out - ref)))

    print("KERNEL_OK")
</pallas_src>

<mosaic_0001>
module attributes {stable_mosaic.version = 11 : i64} {
  func.func @_conv3x3_relu_kernel(%arg0: i32, %arg1: memref<32x64xf32, #tpu.memory_space<vmem>>, %arg2: memref<192x128xf32, #tpu.memory_space<vmem>>, %arg3: memref<1x128xf32, #tpu.memory_space<vmem>>, %arg4: memref<32x128xf32, #tpu.memory_space<vmem>>) attributes {dimension_semantics = [#tpu.dimension_semantics<arbitrary>], iteration_bounds = array<i64: 1>, scalar_prefetch = 0 : i64, scratch_operands = 0 : i64, tpu.core_type = #tpu.core_type<tc>, window_params = [{pipeline_mode = #tpu.pipeline_mode<synchronous>, transform_indices = @transform_0, window_bounds = array<i64: 32, 64>}, {pipeline_mode = #tpu.pipeline_mode<synchronous>, transform_indices = @transform_1, window_bounds = array<i64: 192, 128>}, {pipeline_mode = #tpu.pipeline_mode<synchronous>, transform_indices = @transform_2, window_bounds = array<i64: 1, 128>}, {pipeline_mode = #tpu.pipeline_mode<synchronous>, transform_indices = @transform_3, window_bounds = array<i64: 32, 128>}]} {
    %c0 = arith.constant 0 : index
    %c0_0 = arith.constant 0 : index
    %0 = vector.load %arg1[%c0, %c0_0] : memref<32x64xf32, #tpu.memory_space<vmem>>, vector<32x64xf32>
    %1 = tpu.iota {dimensions = array<i32: 0>} : vector<32x64xi32>
    %c16_i32 = arith.constant 16 : i32
    %c0_i32 = arith.constant 0 : i32
    %2 = arith.cmpi eq, %c16_i32, %c0_i32 : i32
    %c1_i32 = arith.constant 1 : i32
    %3 = arith.select %2, %c1_i32, %c16_i32 : i32
    %4 = vector.broadcast %3 : i32 to vector<32x64xi32>
    %5 = arith.remsi %1, %4 : vector<32x64xi32>
    %c0_i32_1 = arith.constant 0 : i32
    %6 = vector.broadcast %c0_i32_1 : i32 to vector<32x64xi32>
    %7 = arith.cmpi ne, %5, %6 : vector<32x64xi32>
    %c0_i32_2 = arith.constant 0 : i32
    %8 = vector.broadcast %c0_i32_2 : i32 to vector<32x64xi32>
    %9 = arith.cmpi slt, %5, %8 : vector<32x64xi32>
    %c0_i32_3 = arith.constant 0 : i32
    %10 = arith.cmpi slt, %3, %c0_i32_3 : i32
    %11 = vector.broadcast %10 : i1 to vector<32x64xi1>
    %12 = vector.broadcast %11 : vector<32x64xi1> to vector<32x64xi1>
    %13 = arith.xori %9, %12 : vector<32x64xi1>
    %14 = arith.andi %13, %7 : vector<32x64xi1>
    %15 = vector.broadcast %3 : i32 to vector<32x64xi32>
    %16 = arith.addi %5, %15 : vector<32x64xi32>
    %17 = arith.select %14, %16, %5 : vector<32x64xi1>, vector<32x64xi32>
    %cst = arith.constant 0.000000e+00 : f32
    %18 = vector.broadcast %cst : f32 to vector<32x64xf32>
    %c0_i32_4 = arith.constant 0 : i32
    %19 = vector.broadcast %c0_i32_4 : i32 to vector<32x64xi32>
    %20 = arith.cmpi eq, %17, %19 : vector<32x64xi32>
    %c1_i32_5 = arith.constant 1 : i32
    %21 = tpu.dynamic_rotate %0 by %c1_i32_5 dim 0 : vector<32x64xf32>, i32 -> vector<32x64xf32>
    %22 = arith.select %20, %18, %21 : vector<32x64xi1>, vector<32x64xf32>
    %c15_i32 = arith.constant 15 : i32
    %23 = vector.broadcast %c15_i32 : i32 to vector<32x64xi32>
    %24 = arith.cmpi eq, %17, %23 : vector<32x64xi32>
    %c31_i32 = arith.constant 31 : i32
    %25 = tpu.dynamic_rotate %0 by %c31_i32 dim 0 : vector<32x64xf32>, i32 -> vector<32x64xf32>
    %26 = arith.select %24, %18, %25 : vector<32x64xi1>, vector<32x64xf32>
    %27 = tpu.concatenate %22, %0, %26 in 1 : vector<32x64xf32>, vector<32x64xf32>, vector<32x64xf32> -> vector<32x192xf32>
    %c0_6 = arith.constant 0 : index
    %c0_7 = arith.constant 0 : index
    %28 = vector.load %arg3[%c0_6, %c0_7] : memref<1x128xf32, #tpu.memory_space<vmem>>, vector<1x128xf32>
    %c0_8 = arith.constant 0 : index
    %c0_9 = arith.constant 0 : index
    %29 = vector.load %arg2[%c0_8, %c0_9] : memref<192x128xf32, #tpu.memory_space<vmem>>, vector<192x128xf32>
    %cst_10 = arith.constant dense<0.000000e+00> : vector<32x128xf32>
    %30 = tpu.matmul %27, %29, %cst_10 {dimension_numbers = #tpu.dot_dimension_numbers<[1], [0], [0], [1], [0, 0, 1, 1], [], []>} : vector<32x192xf32>, vector<192x128xf32>, vector<32x128xf32> -> vector<32x128xf32>
    %31 = vector.broadcast %28 : vector<1x128xf32> to vector<32x128xf32>
    %32 = arith.addf %31, %30 : vector<32x128xf32>
    %cst_11 = arith.constant 0.000000e+00 : f32
    %33 = vector.broadcast %cst_11 : f32 to vector<32x128xf32>
    %34 = arith.maximumf %32, %33 : vector<32x128xf32>
    %c0_12 = arith.constant 0 : index
    %c0_13 = arith.constant 0 : index
    %35 = vector.load %arg4[%c0_12, %c0_13] : memref<32x128xf32, #tpu.memory_space<vmem>>, vector<32x128xf32>
    tpu.vector_store %arg4[%c0_12, %c0_13], %34 {strides = array<i32>} : memref<32x128xf32, #tpu.memory_space<vmem>>, vector<32x128xf32>,
    return
  }
  func.func @transform_0(%arg0: i32) -> (i32, i32) {
    %c0_i32 = arith.constant 0 : i32
    %c0_i32_0 = arith.constant 0 : i32
    %c0_i32_1 = arith.constant 0 : i32
    return %c0_i32, %c0_i32_0 : i32, i32
  }
  func.func @transform_1(%arg0: i32) -> (i32, i32) {
    %c0_i32 = arith.constant 0 : i32
    %c0_i32_0 = arith.constant 0 : i32
    %c0_i32_1 = arith.constant 0 : i32
    return %c0_i32, %c0_i32_0 : i32, i32
  }
  func.func @transform_2(%arg0: i32) -> (i32, i32) {
    %c0_i32 = arith.constant 0 : i32
    %c0_i32_0 = arith.constant 0 : i32
    %c0_i32_1 = arith.constant 0 : i32
    return %c0_i32, %c0_i32_0 : i32, i32
  }
  func.func @transform_3(%arg0: i32) -> (i32, i32) {
    %c0_i32 = arith.constant 0 : i32
    %c0_i32_0 = arith.constant 0 : i32
    %c0_i32_1 = arith.constant 0 : i32
    return %c0_i32, %c0_i32_0 : i32, i32
  }
}

</mosaic_0001>

<bundles_post_ra>
// kernel: tpu_custom_call.1
= control target key start
LH: loop header
LB: loop body
LE: loop exit
PB: predicated region body
PF: predicated region fallthrough
CT: control target
= control target key end

     0   :  { %8 = vsyncpa [#allocation3], 0  ;;  %s510_s0 = inlined_call_operand.hbm [shape: f32[32,64], index: 0, kind: input, shape index: {}]   ;;  %s511_s1 = inlined_call_operand.hbm [shape: f32[192,128], index: 1, kind: input, shape index: {}]   ;;  %s512_s2 = inlined_call_operand.vmem [shape: f32[1,128], index: 2, kind: input, shape index: {}]   ;;  %s513_s3 = inlined_call_operand.hbm [shape: f32[32,128], index: 3, kind: output, shape index: {}]  }
   0x1   :  { %9 = vsyncpa [#allocation6], 0 }
   0x2   :  { %10 = vsyncpa [#allocation4], 0  ;;  %s15_s14 = sshll.u32 %s510_s0, 4  ;;  %s415_s15 = smov [#allocation2]   ;;  %s16_s14 = int_to_ptr.hbm [resolvable:$true] %s15_s14 }
   0x3   :  { %s17_s16 = sshll.u32 %s415_s15, 4  ;;  %s28_s19 = sshll.u32 %s511_s1, 4  ;;  %s18_s16 = int_to_ptr.vmem [resolvable:$true] %s17_s16  ;;  %s29_s19 = int_to_ptr.hbm [resolvable:$true] %s28_s19 }
   0x4   :  { %s416_s20 = smov 128   ;;  %s417_s21 = smov 8  }
   0x5   :  { %23 = dma.hbm_to_vmem [thread:$0]  %s16_s14, 512, %s18_s16, [#allocation3], %s416_s20, %s416_s20, %s417_s21  }
   0x6   :  { %s418_s22 = smov [#allocation5]  }
   0x7   :  { %s30_s23 = sshll.u32 %s418_s22, 4  ;;  %s31_s23 = int_to_ptr.vmem [resolvable:$true] %s30_s23 }
   0x8   :  { %36 = dma.hbm_to_vmem [thread:$0]  %s29_s19, 3072, %s31_s23, [#allocation6], %s416_s20, %s416_s20, %s417_s21  }
   0x9   :  { %409 = dma.done.wait [#allocation3], 512  }
   0xa   :  { %410 = vsyncadd [#allocation3], 4294966784 }
   0xb   :  { %411 = dma.done.wait [#allocation6], 3072  }
   0xc   :  { %412 = vsyncadd [#allocation6], 4294964224  ;;  %v453_v0 = vld [vmem:[#allocation2 + $0x10] sm:$0xff]  ;;  %v455_v1 = vld [vmem:[#allocation2] sm:$0xff]  ;;  %s419_s0 = smov 64   ;;  %v51_v13 = vlaneseq  ;;  %vm154_vm1 = vcmask 523264  }
   0xd   :  { %146 = vrot.lane.b32.xlu0 %v453_v0, %s419_s0  ;;  %142 = vrot.lane.b32.xlu1 %v455_v1, %s419_s0  ;;  %v175_v2 = vld [vmem:[#allocation5 + $0x78] sm:$0xff]  ;;  %v459_v3 = vld [vmem:[#allocation2 + $0x8] sm:$0xff]  ;;  %v174_v5 = vld [vmem:[#allocation5 + $0x70] sm:$0xff]  ;;  %v125_v21 = vrot.slane %v455_v1, 1  ;;  %v127_v33 = vrot.slane %v453_v0, 1  ;;  %v110_v46 = vrot.slane %v453_v0, 7 }
   0xe   :  { %v461_v4 = vld [vmem:[#allocation2 + $0x18] sm:$0xff]  ;;  %196 = vmatpush.msra.mxu0 %v175_v2  ;;  %294 = vmatpush.msra.mxu3 %v175_v2  ;;  %v173_v6 = vld [vmem:[#allocation5 + $0x68] sm:$0xff]  ;;  %v182_v8 = vld [vmem:[#allocation5 + $0xb0] sm:$0xff]  ;;  %v465_v18 = vshrl.u32 %v51_v13, 7  ;;  %v126_v23 = vrot.slane %v459_v3, 1  ;;  %v108_v47 = vrot.slane %v455_v1, 7 }
   0xf   :  { %v183_v7 = vld [vmem:[#allocation5 + $0xb8] sm:$0xff]  ;;  %293 = vmatpush.msra.mxu2 %v175_v2  ;;  %v331_v9 = vpack.i.bf16 %v461_v4, %v459_v3  ;;  %v172_v10 = vld [vmem:[#allocation5 + $0x60] sm:$0xff]  ;;  %v181_v11 = vld [vmem:[#allocation5 + $0xa8] sm:$0xff]  ;;  %v128_v39 = vrot.slane %v461_v4, 1  ;;  %v111_v49 = vrot.slane %v461_v4, 7  ;;  %v109_v51 = vrot.slane %v459_v3, 7 }
  0x10   :  { %197 = vmatpush.msra.mxu0 %v174_v5  ;;  %296 = vmatpush.msra.mxu3 %v174_v5  ;;  %v171_v12 = vld [vmem:[#allocation5 + $0x58] sm:$0xff]  ;;  %v180_v14 = vld [vmem:[#allocation5 + $0xa0] sm:$0xff]  ;;  %v170_v15 = vld [vmem:[#allocation5 + $0x50] sm:$0xff]  ;;  %vm129_vm0 = vcmp.lt.s32.totalorder %v465_v18, 7  ;;  %v53_v34 = vadd.s32 8, %v465_v18  ;;  %v55_v41 = vadd.s32 24, %v465_v18 }
  0x11   :  { %233 = vmatpush.msra.mxu1 %v183_v7  ;;  %295 = vmatpush.msra.mxu2 %v174_v5  ;;  %v179_v16 = vld [vmem:[#allocation5 + $0x98] sm:$0xff]  ;;  %v169_v17 = vld [vmem:[#allocation5 + $0x48] sm:$0xff]  ;;  %v178_v19 = vld [vmem:[#allocation5 + $0x90] sm:$0xff]  ;;  %v132_v27 = vsel %vm129_vm0, %v125_v21, %v126_v23  ;;  %v131_v36 = vsel %vm129_vm0, %v126_v23, %v127_v33  ;;  %v130_v40 = vsel %vm129_vm0, %v127_v33, %v128_v39  ;;  %v54_v45 = vadd.s32 16, %v465_v18  ;;  %s420_s25 = smov [#allocation7]   ;;  %s275_s28 = sshll.u32 %s513_s3, 4  ;;  %s276_s28 = int_to_ptr.hbm [resolvable:$true] %s275_s28 }
  0x12   :  { %198 = vmatpush.msra.mxu0 %v173_v6  ;;  %298 = vmatpush.msra.mxu3 %v173_v6  ;;  %v168_v20 = vld [vmem:[#allocation5 + $0x40] sm:$0xff]  ;;  %v177_v22 = vld [vmem:[#allocation5 + $0x88] sm:$0xff]  ;;  %v167_v24 = vld [vmem:[#allocation5 + $0x38] sm:$0xff]  ;;  %v67_v35 = vand.u32 15, %v53_v34  ;;  %v81_v42 = vand.u32 15, %v55_v41  ;;  %v133_v43 = vsel %vm129_vm0, %v128_v39, %v125_v21  ;;  %v60_v48 = vand.u32 15, %v465_v18 }
  0x13   :  { %234 = vmatpush.msra.mxu1 %v182_v8  ;;  %297 = vmatpush.msra.mxu2 %v173_v6  ;;  %v176_v25 = vld [vmem:[#allocation5 + $0x80] sm:$0xff]  ;;  %v166_v26 = vld [vmem:[#allocation5 + $0x30] sm:$0xff]  ;;  %v165_v28 = vld [vmem:[#allocation5 + $0x28] sm:$0xff]  ;;  %v74_v50 = vand.u32 15, %v54_v45  ;;  %vm112_vm4 = vcmp.lt.s32.totalorder %v465_v18, 1 }
  0x14   :  { %199 = vmatpush.msra.mxu0 %v172_v10  ;;  %300 = vmatpush.msra.mxu3 %v172_v10  ;;  %v164_v29 = vld [vmem:[#allocation5 + $0x20] sm:$0xff]  ;;  %v163_v30 = vld [vmem:[#allocation5 + $0x18] sm:$0xff]  ;;  %v162_v31 = vld [vmem:[#allocation5 + $0x10] sm:$0xff]  ;;  %vm122_vm2 = vcmp.eq.s32.totalorder %v67_v35, 15  ;;  %vm124_vm3 = vcmp.eq.s32.totalorder %v81_v42, 15  ;;  %vm104_vm5 = vcmp.eq.s32.totalorder %v60_v48, 0  ;;  %v116_v52 = vsel %vm112_vm4, %v111_v49, %v108_v47 }
  0x15   :  { %332 = vrot.lane.b32.xlu0 %v331_v9, %s419_s0  ;;  %235 = vmatpush.msra.mxu1 %v181_v11  ;;  %v161_v32 = vld [vmem:[#allocation5 + $0x8] sm:$0xff]  ;;  %v135_v37 = vsel %vm122_vm2, 0.0, %v131_v36  ;;  %v160_v38 = vld [vmem:[#allocation5] sm:$0xff]  ;;  %v137_v44 = vsel %vm124_vm3, 0.0, %v133_v43  ;;  %vm106_vm6 = vcmp.eq.s32.totalorder %v74_v50, 0  ;;  %v114_v53 = vsel %vm112_vm4, %v109_v51, %v110_v46 }
  0x16   :  { %200 = vmatpush.msra.mxu0 %v171_v12  ;;  %302 = vmatpush.msra.mxu3 %v171_v12  ;;  %v117_v54 = vsel %vm104_vm5, 0.0, %v116_v52  ;;  %v119_v55 = vsel %vm106_vm6, 0.0, %v114_v53  ;;  %v115_v61 = vsel %vm112_vm4, %v108_v47, %v109_v51  ;;  %v113_v62 = vsel %vm112_vm4, %v110_v46, %v111_v49  ;;  %v336_v5 = vld [vmem:[%s512_s2] ss:$0 sm:$0xff]  ;;  %s273_s2 = sshll.u32 %s420_s25, 4  ;;  %s274_s2 = int_to_ptr.vmem [resolvable:$true] %s273_s2 }
  0x17   :  { %236 = vmatpush.msra.mxu1 %v180_v14  ;;  %299 = vmatpush.msra.mxu2 %v172_v10 }
  0x18   :  { %201 = vmatpush.msra.mxu0 %v170_v15  ;;  %304 = vmatpush.msra.mxu3 %v170_v15 }
  0x19   :  { %237 = vmatpush.msra.mxu1 %v179_v16  ;;  %301 = vmatpush.msra.mxu2 %v171_v12 }
  0x1a   :  { %202 = vmatpush.msra.mxu0 %v169_v17  ;;  %306 = vmatpush.msra.mxu3 %v169_v17 }
  0x1b   :  { %238 = vmatpush.msra.mxu1 %v178_v19  ;;  %303 = vmatpush.msra.mxu2 %v170_v15 }
  0x1c   :  { %203 = vmatpush.msra.mxu0 %v168_v20  ;;  %308 = vmatpush.msra.mxu3 %v168_v20 }
  0x1d   :  { %239 = vmatpush.msra.mxu1 %v177_v22  ;;  %305 = vmatpush.msra.mxu2 %v169_v17 }
  0x1e   :  { %204 = vmatpush.msra.mxu0 %v167_v24  ;;  %310 = vmatpush.msra.mxu3 %v167_v24 }
  0x1f   :  { %240 = vmatpush.msra.mxu1 %v176_v25  ;;  %307 = vmatpush.msra.mxu2 %v168_v20 }
  0x20   :  { %205 = vmatpush.msra.mxu0 %v166_v26  ;;  %312 = vmatpush.msra.mxu3 %v166_v26 }
  0x21   :  { %289 = vmatmul.msk.f32.vlgmr.msra.gmra.mxu1 %vm154_vm1, %v132_v27  ;;  %309 = vmatpush.msra.mxu2 %v167_v24 }
  0x22   :  { %206 = vmatpush.msra.mxu0 %v165_v28  ;;  %314 = vmatpush.msra.mxu3 %v165_v28 }
  0x23   :  { %311 = vmatpush.msra.mxu2 %v166_v26 }
  0x24   :  { %207 = vmatpush.msra.mxu0 %v164_v29  ;;  %316 = vmatpush.msra.mxu3 %v164_v29 }
  0x25   :  { %313 = vmatpush.msra.mxu2 %v165_v28 }
  0x26   :  { %208 = vmatpush.msra.mxu0 %v163_v30  ;;  %318 = vmatpush.msra.mxu3 %v163_v30 }
  0x27   :  { %315 = vmatpush.msra.mxu2 %v164_v29 }
  0x28   :  { %209 = vmatpush.msra.mxu0 %v162_v31  ;;  %320 = vmatpush.msra.mxu3 %v162_v31 }
  0x29   :  { %317 = vmatpush.msra.mxu2 %v163_v30  ;;  %290 = vmatmul.msk.f32.gmra.mxu1 %vm154_vm1, %v135_v37 }
  0x2a   :  { %210 = vmatpush.msra.mxu0 %v161_v32  ;;  %322 = vmatpush.msra.mxu3 %v161_v32 }
  0x2b   :  { %319 = vmatpush.msra.mxu2 %v162_v31 }
  0x2c   :  { %211 = vmatpush.msra.mxu0 %v160_v38  ;;  %324 = vmatpush.msra.mxu3 %v160_v38 }
  0x2d   :  { %321 = vmatpush.msra.mxu2 %v161_v32 }
  0x2f   :  { %323 = vmatpush.msra.mxu2 %v160_v38 }
  0x31   :  { %291 = vmatmul.msk.f32.gmra.mxu1 %vm154_vm1, %v130_v40 }
  0x39   :  { %292 = vmatmul.msk.f32.gmra.mxu1 %vm154_vm1, %v137_v44 }
  0x7f   :  { %v147_v56 = vpop.permute.xlu0 %146  ;;  %v143_v57 = vpop.permute.xlu1 %142 }
  0x80   :  { %v155_v58 = vsel %vm154_vm1, %v117_v54, %v143_v57  ;;  %v157_v59 = vsel %vm154_vm1, %v119_v55, %v147_v56 }
  0x81   :  { %212 = vmatmul.f32.vlgmr.msra.gmra.mxu0 %v155_v58  ;;  %218 = vmatmul.f32.vlgmr.msra.gmra.mxu3 %v157_v59 }
  0x87   :  { %v333_v60 = vpop.permute.xlu0 %332 }
  0x88   :  { %v335_v63 = vunpack.i.h.bf16 %v333_v60  ;;  %v334_v0 = vunpack.i.l.bf16 %v333_v60 }
  0x8a   :  { %v156_v1 = vsel %vm154_vm1, %v115_v61, %v334_v0  ;;  %v158_v2 = vsel %vm154_vm1, %v113_v62, %v335_v63 }
  0x8b   :  { %215 = vmatmul.f32.vlgmr.msra.gmra.mxu2 %v156_v1  ;;  %221 = vmatmul.f32.gmra.mxu3 %v158_v2 }
  0x9e   :  { %v242_v3 = vpop.f32.mrf.mxu1 }
  0xa6   :  { %v245_v4 = vpop.f32.mrf.mxu1 }
  0xae   :  { %v248_v9 = vpop.f32.mrf.mxu1 }
  0xb6   :  { %v251_v15 = vpop.f32.mrf.mxu1 }
  0xfe   :  { %v213_v6 = vpop.f32.mrf.mxu0 }
  0xff   :  { %v243_v7 = vadd.f32 %v242_v3, %v213_v6 }
 0x101   :  { %v257_v8 = vadd.f32 %v336_v5, %v243_v7 }
 0x103   :  { %v261_v10 = vmax.f32 %v257_v8, 0.0 }
 0x104   :  { %v219_v11 = vpop.f32.mrf.mxu3 }
 0x105   :  { %265 = vst [vmem:[#allocation7] sm:$0xff] %v261_v10  ;;  %v249_v12 = vadd.f32 %v248_v9, %v219_v11 }
 0x107   :  { %v259_v13 = vadd.f32 %v336_v5, %v249_v12 }
 0x109   :  { %v263_v14 = vmax.f32 %v259_v13, 0.0 }
 0x10b   :  { %267 = vst [vmem:[#allocation7 + $0x10] sm:$0xff] %v263_v14 }
 0x10e   :  { %v216_v16 = vpop.f32.mrf.mxu2  ;;  %v222_v17 = vpop.f32.mrf.mxu3 }
 0x10f   :  { %v246_v18 = vadd.f32 %v245_v4, %v216_v16  ;;  %v252_v19 = vadd.f32 %v251_v15, %v222_v17 }
 0x111   :  { %v258_v20 = vadd.f32 %v336_v5, %v246_v18  ;;  %v260_v21 = vadd.f32 %v336_v5, %v252_v19 }
 0x113   :  { %v262_v22 = vmax.f32 %v258_v20, 0.0  ;;  %v264_v23 = vmax.f32 %v260_v21, 0.0 }
 0x115   :  { %266 = vst [vmem:[#allocation7 + $0x8] sm:$0xff] %v262_v22 }
 0x116   :  { %268 = vst [vmem:[#allocation7 + $0x18] sm:$0xff] %v264_v23 }
 0x117   :  { %281 = dma.vmem_to_hbm [thread:$0]  %s274_s2, 512, %s276_s28, [#allocation4], %s416_s20, %s416_s20, %s417_s21  }
 0x118   :  { %413 = dma.done.wait [#allocation4], 512  }
 0x119   :  { %414 = vsyncadd [#allocation4], 4294966784 }
 0x11a   :  { %286 = vsyncpa [#allocation3], 1 }
 0x11b   :  { %287 = vsyncpa [#allocation6], 1 }
 0x11c   :  { %288 = vsyncpa [#allocation4], 1 }

</bundles_post_ra>
